<compile_context>
chip_gen: v7x
topology: tpu7x:2x2x1
jax: 0.10.0
libtpu: 0.0.40
codegen_flags: <defaults>
</compile_context>

<pallas_src>
import functools

import numpy as np
import jax
import jax.numpy as jnp
from jax.experimental import pallas as pl
from jax.experimental.pallas import tpu as pltpu


def attention_kernel(x_ref, wqkv_ref, bqkv_ref, wproj_ref, bproj_ref, o_ref,
                     qkv_scr, wa_scr, *, n_heads, head_dim):
    Bb, N, D = x_ref.shape
    cdt = x_ref.dtype                       # compute dtype (bf16 by default)

    # ---- QKV projection: one full-width MXU matmul for the whole block. ----
    # Scale (1/sqrt(head_dim)) is already folded into the Q columns of wqkv.
    x2 = x_ref[...].reshape(Bb * N, D)                                   # (Bb*N, D)
    qkv = jnp.dot(x2, wqkv_ref[...], preferred_element_type=jnp.float32)
    qkv = qkv + bqkv_ref[...].astype(jnp.float32)                        # f32 bias add
    qkv_scr[...] = qkv.astype(cdt)          # route through VMEM scratch (no long-lived f32 value)

    # ---- Per-head attention; results written into wa scratch ("concat"). ----
    for h in range(n_heads):
        lo = h * head_dim
        q = qkv_scr[:, lo:lo + head_dim].reshape(Bb, N, head_dim)
        k = qkv_scr[:, D + lo:D + lo + head_dim].reshape(Bb, N, head_dim)
        v = qkv_scr[:, 2 * D + lo:2 * D + lo + head_dim].reshape(Bb, N, head_dim)

        dp = jnp.einsum('bqd,bkd->bqk', q, k,
                        preferred_element_type=jnp.float32)              # (Bb, N, N) f32
        m = jnp.max(dp, axis=-1, keepdims=True)
        e = jnp.exp(dp - m)                                              # softmax in f32
        s = jnp.sum(e, axis=-1, keepdims=True)
        attn = (e * pl.reciprocal(s, approx=True)).astype(cdt)           # attn_drop p=0
        wa = jnp.einsum('bqk,bkd->bqd', attn, v,
                        preferred_element_type=jnp.float32)              # (Bb, N, hd)
        wa_scr[:, lo:lo + head_dim] = wa.reshape(Bb * N, head_dim).astype(cdt)

    # ---- Output projection: ONE full-contraction matmul + f32 bias. ----
    out = jnp.dot(wa_scr[...], wproj_ref[...], preferred_element_type=jnp.float32)
    out = out + bproj_ref[...].astype(jnp.float32)                       # proj_drop p=0
    o_ref[...] = out.reshape(Bb, N, D).astype(o_ref.dtype)


def attention_pallas(x, wqkv, bqkv, wproj, bproj, *, n_heads,
                     block_batch=None, compute_dtype=jnp.bfloat16,
                     vmem_limit_bytes=None):
    """x: (B, N, D); wqkv: (3D, D); bqkv: (3D,); wproj: (D, D); bproj: (D,)."""
    B, N, D = x.shape
    orig_dtype = x.dtype
    head_dim = D // n_heads
    scale = float(head_dim) ** -0.5
    cdt = compute_dtype
    csize = np.dtype(cdt).itemsize
    osize = np.dtype(orig_dtype).itemsize

    # ---- One-time wrapper-side weight prep (XLA, outside the kernel). ----
    # Transpose to (in, out), fold the softmax scale into the Q columns, cast
    # weights to the compute dtype. Biases are kept in f32.
    col_scale = jnp.concatenate([jnp.full((D,), scale, dtype=jnp.float32),
                                 jnp.ones((2 * D,), dtype=jnp.float32)])
    wqkv_t = (wqkv.T.astype(jnp.float32) * col_scale[None, :]).astype(cdt)   # (D, 3D)
    bqkv_s = (bqkv.astype(jnp.float32) * col_scale).reshape(1, 3 * D)        # f32
    wproj_t = wproj.T.astype(cdt)                                            # (D, D)
    bproj2 = bproj.astype(jnp.float32).reshape(1, D)                         # f32
    x_c = x.astype(cdt)

    # ---- Per-device VMEM budget (v7x: 64 MiB physical; v5e/v6e: 128 MiB). ----
    if vmem_limit_bytes is None:
        try:
            cap = pltpu.get_tpu_info().vmem_capacity_bytes
        except Exception:
            cap = 128 * 1024 * 1024
        vmem_limit_bytes = min(int(0.75 * cap), 100 * 1024 * 1024)

    # ---- Block-batch heuristic: largest block that fits VMEM, prefer an    ----
    # ---- even grid extent (v7x: 2 TensorCores) and at least 2 grid steps.  ----
    def step_bytes(bb):
        rows = bb * N
        x_blk = 2 * rows * D * csize                 # double-buffered input block
        o_blk = 2 * rows * D * osize                 # double-buffered output block
        w_blk = 2 * (D * 3 * D + D * D) * csize + 2 * 4 * D * 4   # weights + biases (dbl-buf)
        scr = rows * (3 * D + D) * csize             # qkv + wa VMEM scratch
        tmp = rows * 3 * D * 4 + 4 * bb * N * N * 4  # transient f32 qkv value + softmax temps
        return x_blk + o_blk + w_blk + scr + tmp

    if block_batch is None:
        cands = [c for c in (32, 16, 8, 4, 2, 1) if c <= B and B % c == 0]
        feasible = [c for c in cands
                    if step_bytes(c) <= int(0.6 * vmem_limit_bytes)] or [1]

        def pref(c):
            g = B // c
            return (g >= 2, g % 2 == 0, c)
        block_batch = max(feasible, key=pref)
    Bb = block_batch
    assert B % Bb == 0, "block_batch must divide the batch size"

    # ---- Advisory cost estimate for the XLA scheduler. ----
    flops = (2 * B * N * D * (3 * D)                       # QKV projection
             + 4 * B * n_heads * N * N * head_dim          # QK^T and attn @ V
             + 2 * B * N * D * D)                          # output projection
    transcendentals = B * n_heads * N * N                  # exp in softmax
    bytes_accessed = (B * N * D * csize + B * N * D * osize
                      + (D * 3 * D + D * D) * csize + 4 * D * 4)
    cost = pl.CostEstimate(flops=int(flops),
                           transcendentals=int(transcendentals),
                           bytes_accessed=int(bytes_accessed))

    kernel = functools.partial(attention_kernel,
                               n_heads=n_heads, head_dim=head_dim)

    return pl.pallas_call(
        kernel,
        out_shape=jax.ShapeDtypeStruct((B, N, D), orig_dtype),
        grid_spec=pltpu.PrefetchScalarGridSpec(
            num_scalar_prefetch=0,
            grid=(B // Bb,),
            in_specs=[
                pl.BlockSpec((Bb, N, D), lambda b: (b, 0, 0)),
                # Grid-invariant weights/biases (constant index_map -> fetched once).
                pl.BlockSpec((D, 3 * D), lambda b: (0, 0)),
                pl.BlockSpec((1, 3 * D), lambda b: (0, 0)),
                pl.BlockSpec((D, D), lambda b: (0, 0)),
                pl.BlockSpec((1, D), lambda b: (0, 0)),
            ],
            out_specs=pl.BlockSpec((Bb, N, D), lambda b: (b, 0, 0)),
            scratch_shapes=[
                pltpu.VMEM((Bb * N, 3 * D), cdt),   # qkv scratch (compute dtype)
                pltpu.VMEM((Bb * N, D), cdt),       # head-concat scratch
            ],
        ),
        compiler_params=pltpu.CompilerParams(
            dimension_semantics=("parallel",),
            vmem_limit_bytes=int(vmem_limit_bytes)),
        cost_estimate=cost,
    )(x_c, wqkv_t, bqkv_s, wproj_t, bproj2)


def attention_ref(x, wqkv, bqkv, wproj, bproj, *, n_heads):
    """Pure-JAX reference matching the PyTorch forward."""
    B, N, D = x.shape
    hd = D // n_heads
    scale = hd ** -0.5
    qkv = jnp.einsum("bnd,ed->bne", x, wqkv) + bqkv                      # (B, N, 3D)
    qkv = qkv.reshape(B, N, 3, n_heads, hd).transpose(2, 0, 3, 1, 4)     # (3,B,H,N,hd)
    q, k, v = qkv[0], qkv[1], qkv[2]
    dp = jnp.einsum("bhqd,bhkd->bhqk", q, k) * scale
    attn = jax.nn.softmax(dp, axis=-1)
    wa = jnp.einsum("bhqk,bhkd->bhqd", attn, v)                          # (B,H,N,hd)
    wa = wa.transpose(0, 2, 1, 3).reshape(B, N, D)
    return jnp.einsum("bnd,ed->bne", wa, wproj) + bproj


if __name__ == "__main__":
    B, N, D, H = 4, 8, 32, 4   # batch, tokens (n_patches+1), dim, n_heads (hd=8)

    key = jax.random.PRNGKey(0)
    kx, kw1, kb1, kw2, kb2 = jax.random.split(key, 5)

    x = jax.random.normal(kx, (B, N, D), dtype=jnp.float32)
    # deterministic synthetic parameters (PyTorch nn.Linear layout)
    wqkv = jax.random.normal(kw1, (3 * D, D), dtype=jnp.float32) * 0.05
    bqkv = jax.random.normal(kb1, (3 * D,), dtype=jnp.float32) * 0.05
    wproj = jax.random.normal(kw2, (D, D), dtype=jnp.float32) * 0.05
    bproj = jax.random.normal(kb2, (D,), dtype=jnp.float32) * 0.05

    ref = attention_ref(x, wqkv, bqkv, wproj, bproj, n_heads=H)

    # f32 compute path: close to the reference (approx reciprocal is the only
    # extra rounding in the softmax normalization).
    out_f32 = attention_pallas(x, wqkv, bqkv, wproj, bproj, n_heads=H,
                               compute_dtype=jnp.float32)
    out_f32 = jax.block_until_ready(out_f32)
    assert out_f32.shape == (B, N, D)
    assert jnp.allclose(out_f32, ref, atol=1e-2, rtol=1e-2), "f32 mismatch vs reference"

    # default bf16 compute path (MXU-native on v5e/v6e/v7x): looser tolerance,
    # since weights/activations are quantized to bf16 (accumulation stays f32).
    out_bf16 = attention_pallas(x, wqkv, bqkv, wproj, bproj, n_heads=H)
    out_bf16 = jax.block_until_ready(out_bf16)
    assert out_bf16.shape == (B, N, D)
    assert jnp.allclose(out_bf16, ref, atol=3e-2, rtol=3e-2), "bf16 mismatch vs reference"

    print("KERNEL_OK")
</pallas_src>

<mosaic_0001>
module attributes {stable_mosaic.version = 11 : i64} {
  func.func @attention_kernel(%arg0: i32, %arg1: memref<2x8x32xf32, #tpu.memory_space<vmem>>, %arg2: memref<32x96xf32, #tpu.memory_space<vmem>>, %arg3: memref<1x96xf32, #tpu.memory_space<vmem>>, %arg4: memref<32x32xf32, #tpu.memory_space<vmem>>, %arg5: memref<1x32xf32, #tpu.memory_space<vmem>>, %arg6: memref<2x8x32xf32, #tpu.memory_space<vmem>>, %arg7: memref<16x96xf32, #tpu.memory_space<vmem>>, %arg8: memref<16x32xf32, #tpu.memory_space<vmem>>) attributes {dimension_semantics = [#tpu.dimension_semantics<parallel>], iteration_bounds = array<i64: 2>, scalar_prefetch = 0 : i64, scratch_operands = 2 : i64, tpu.core_type = #tpu.core_type<tc>, window_params = [{transform_indices = @transform_0, window_bounds = array<i64: 2, 8, 32>}, {pipeline_mode = #tpu.pipeline_mode<synchronous>, transform_indices = @transform_1, window_bounds = array<i64: 32, 96>}, {pipeline_mode = #tpu.pipeline_mode<synchronous>, transform_indices = @transform_2, window_bounds = array<i64: 1, 96>}, {pipeline_mode = #tpu.pipeline_mode<synchronous>, transform_indices = @transform_3, window_bounds = array<i64: 32, 32>}, {pipeline_mode = #tpu.pipeline_mode<synchronous>, transform_indices = @transform_4, window_bounds = array<i64: 1, 32>}, {transform_indices = @transform_5, window_bounds = array<i64: 2, 8, 32>}]} {
    %c0 = arith.constant 0 : index
    %c0_0 = arith.constant 0 : index
    %c0_1 = arith.constant 0 : index
    %0 = vector.load %arg1[%c0, %c0_0, %c0_1] : memref<2x8x32xf32, #tpu.memory_space<vmem>>, vector<2x8x32xf32>
    %1 = vector.shape_cast %0 : vector<2x8x32xf32> to vector<16x32xf32>
    %c0_2 = arith.constant 0 : index
    %c0_3 = arith.constant 0 : index
    %2 = vector.load %arg2[%c0_2, %c0_3] : memref<32x96xf32, #tpu.memory_space<vmem>>, vector<32x96xf32>
    %cst = arith.constant dense<0.000000e+00> : vector<16x96xf32>
    %3 = tpu.matmul %1, %2, %cst {dimension_numbers = #tpu.dot_dimension_numbers<[1], [0], [0], [1], [0, 0, 1, 1], [], []>} : vector<16x32xf32>, vector<32x96xf32>, vector<16x96xf32> -> vector<16x96xf32>
    %c0_4 = arith.constant 0 : index
    %c0_5 = arith.constant 0 : index
    %4 = vector.load %arg3[%c0_4, %c0_5] : memref<1x96xf32, #tpu.memory_space<vmem>>, vector<1x96xf32>
    %5 = vector.broadcast %4 : vector<1x96xf32> to vector<16x96xf32>
    %6 = arith.addf %3, %5 : vector<16x96xf32>
    %c0_6 = arith.constant 0 : index
    %c0_7 = arith.constant 0 : index
    %7 = vector.load %arg7[%c0_6, %c0_7] : memref<16x96xf32, #tpu.memory_space<vmem>>, vector<16x96xf32>
    tpu.vector_store %arg7[%c0_6, %c0_7], %6 {strides = array<i32>} : memref<16x96xf32, #tpu.memory_space<vmem>>, vector<16x96xf32>,
    %c0_8 = arith.constant 0 : index
    %c0_9 = arith.constant 0 : index
    %8 = vector.load %arg7[%c0_8, %c0_9] : memref<16x96xf32, #tpu.memory_space<vmem>>, vector<16x8xf32>
    %9 = vector.shape_cast %8 : vector<16x8xf32> to vector<2x8x8xf32>
    %c0_10 = arith.constant 0 : index
    %c32 = arith.constant 32 : index
    %10 = vector.load %arg7[%c0_10, %c32] : memref<16x96xf32, #tpu.memory_space<vmem>>, vector<16x8xf32>
    %11 = vector.shape_cast %10 : vector<16x8xf32> to vector<2x8x8xf32>
    %c0_11 = arith.constant 0 : index
    %c64 = arith.constant 64 : index
    %12 = vector.load %arg7[%c0_11, %c64] : memref<16x96xf32, #tpu.memory_space<vmem>>, vector<16x8xf32>
    %13 = vector.shape_cast %12 : vector<16x8xf32> to vector<2x8x8xf32>
    "tpu.trace_start"() <{level = 10 : i32, message = "bqd,bkd->bqk"}> : () -> ()
    %cst_12 = arith.constant dense<0.000000e+00> : vector<2x8x8xf32>
    %14 = tpu.matmul %9, %11, %cst_12 {dimension_numbers = #tpu.dot_dimension_numbers<[2], [2], [1], [1], [0, 0, 0, 1, 1, 1], [0], [0]>} : vector<2x8x8xf32>, vector<2x8x8xf32>, vector<2x8x8xf32> -> vector<2x8x8xf32>
    "tpu.trace_stop"() : () -> ()
    %cst_13 = arith.constant dense<0xFF800000> : vector<2x8xf32>
    %15 = vector.multi_reduction <maximumf>, %14, %cst_13 [2] : vector<2x8x8xf32> to vector<2x8xf32>
    %16 = vector.shape_cast %15 : vector<2x8xf32> to vector<2x8x1xf32>
    %17 = vector.broadcast %16 : vector<2x8x1xf32> to vector<2x8x8xf32>
    %18 = arith.subf %14, %17 : vector<2x8x8xf32>
    %19 = math.exp %18 : vector<2x8x8xf32>
    %cst_14 = arith.constant dense<0.000000e+00> : vector<2x8xf32>
    %20 = vector.multi_reduction <add>, %19, %cst_14 [2] : vector<2x8x8xf32> to vector<2x8xf32>
    %21 = vector.shape_cast %20 : vector<2x8xf32> to vector<2x8x1xf32>
    %22 = tpu.reciprocal %21 {approx = true} : vector<2x8x1xf32> -> vector<2x8x1xf32>
    %23 = vector.broadcast %22 : vector<2x8x1xf32> to vector<2x8x8xf32>
    %24 = arith.mulf %19, %23 : vector<2x8x8xf32>
    "tpu.trace_start"() <{level = 10 : i32, message = "bqk,bkd->bqd"}> : () -> ()
    %cst_15 = arith.constant dense<0.000000e+00> : vector<2x8x8xf32>
    %25 = tpu.matmul %24, %13, %cst_15 {dimension_numbers = #tpu.dot_dimension_numbers<[2], [1], [1], [2], [0, 0, 0, 1, 1, 2], [0], [0]>} : vector<2x8x8xf32>, vector<2x8x8xf32>, vector<2x8x8xf32> -> vector<2x8x8xf32>
    "tpu.trace_stop"() : () -> ()
    %26 = vector.shape_cast %25 : vector<2x8x8xf32> to vector<16x8xf32>
    %c0_16 = arith.constant 0 : index
    %c0_17 = arith.constant 0 : index
    %27 = vector.load %arg8[%c0_16, %c0_17] : memref<16x32xf32, #tpu.memory_space<vmem>>, vector<16x8xf32>
    tpu.vector_store %arg8[%c0_16, %c0_17], %26 {strides = array<i32>} : memref<16x32xf32, #tpu.memory_space<vmem>>, vector<16x8xf32>,
    %c0_18 = arith.constant 0 : index
    %c8 = arith.constant 8 : index
    %28 = vector.load %arg7[%c0_18, %c8] : memref<16x96xf32, #tpu.memory_space<vmem>>, vector<16x8xf32>
    %29 = vector.shape_cast %28 : vector<16x8xf32> to vector<2x8x8xf32>
    %c0_19 = arith.constant 0 : index
    %c40 = arith.constant 40 : index
    %30 = vector.load %arg7[%c0_19, %c40] : memref<16x96xf32, #tpu.memory_space<vmem>>, vector<16x8xf32>
    %31 = vector.shape_cast %30 : vector<16x8xf32> to vector<2x8x8xf32>
    %c0_20 = arith.constant 0 : index
    %c72 = arith.constant 72 : index
    %32 = vector.load %arg7[%c0_20, %c72] : memref<16x96xf32, #tpu.memory_space<vmem>>, vector<16x8xf32>
    %33 = vector.shape_cast %32 : vector<16x8xf32> to vector<2x8x8xf32>
    "tpu.trace_start"() <{level = 10 : i32, message = "bqd,bkd->bqk"}> : () -> ()
    %cst_21 = arith.constant dense<0.000000e+00> : vector<2x8x8xf32>
    %34 = tpu.matmul %29, %31, %cst_21 {dimension_numbers = #tpu.dot_dimension_numbers<[2], [2], [1], [1], [0, 0, 0, 1, 1, 1], [0], [0]>} : vector<2x8x8xf32>, vector<2x8x8xf32>, vector<2x8x8xf32> -> vector<2x8x8xf32>
    "tpu.trace_stop"() : () -> ()
    %cst_22 = arith.constant dense<0xFF800000> : vector<2x8xf32>
    %35 = vector.multi_reduction <maximumf>, %34, %cst_22 [2] : vector<2x8x8xf32> to vector<2x8xf32>
    %36 = vector.shape_cast %35 : vector<2x8xf32> to vector<2x8x1xf32>
    %37 = vector.broadcast %36 : vector<2x8x1xf32> to vector<2x8x8xf32>
    %38 = arith.subf %34, %37 : vector<2x8x8xf32>
    %39 = math.exp %38 : vector<2x8x8xf32>
    %cst_23 = arith.constant dense<0.000000e+00> : vector<2x8xf32>
    %40 = vector.multi_reduction <add>, %39, %cst_23 [2] : vector<2x8x8xf32> to vector<2x8xf32>
    %41 = vector.shape_cast %40 : vector<2x8xf32> to vector<2x8x1xf32>
    %42 = tpu.reciprocal %41 {approx = true} : vector<2x8x1xf32> -> vector<2x8x1xf32>
    %43 = vector.broadcast %42 : vector<2x8x1xf32> to vector<2x8x8xf32>
    %44 = arith.mulf %39, %43 : vector<2x8x8xf32>
    "tpu.trace_start"() <{level = 10 : i32, message = "bqk,bkd->bqd"}> : () -> ()
    %cst_24 = arith.constant dense<0.000000e+00> : vector<2x8x8xf32>
    %45 = tpu.matmul %44, %33, %cst_24 {dimension_numbers = #tpu.dot_dimension_numbers<[2], [1], [1], [2], [0, 0, 0, 1, 1, 2], [0], [0]>} : vector<2x8x8xf32>, vector<2x8x8xf32>, vector<2x8x8xf32> -> vector<2x8x8xf32>
    "tpu.trace_stop"() : () -> ()
    %46 = vector.shape_cast %45 : vector<2x8x8xf32> to vector<16x8xf32>
    %c0_25 = arith.constant 0 : index
    %c8_26 = arith.constant 8 : index
    %47 = vector.load %arg8[%c0_25, %c8_26] : memref<16x32xf32, #tpu.memory_space<vmem>>, vector<16x8xf32>
    tpu.vector_store %arg8[%c0_25, %c8_26], %46 {strides = array<i32>} : memref<16x32xf32, #tpu.memory_space<vmem>>, vector<16x8xf32>,
    %c0_27 = arith.constant 0 : index
    %c16 = arith.constant 16 : index
    %48 = vector.load %arg7[%c0_27, %c16] : memref<16x96xf32, #tpu.memory_space<vmem>>, vector<16x8xf32>
    %49 = vector.shape_cast %48 : vector<16x8xf32> to vector<2x8x8xf32>
    %c0_28 = arith.constant 0 : index
    %c48 = arith.constant 48 : index
    %50 = vector.load %arg7[%c0_28, %c48] : memref<16x96xf32, #tpu.memory_space<vmem>>, vector<16x8xf32>
    %51 = vector.shape_cast %50 : vector<16x8xf32> to vector<2x8x8xf32>
    %c0_29 = arith.constant 0 : index
    %c80 = arith.constant 80 : index
    %52 = vector.load %arg7[%c0_29, %c80] : memref<16x96xf32, #tpu.memory_space<vmem>>, vector<16x8xf32>
    %53 = vector.shape_cast %52 : vector<16x8xf32> to vector<2x8x8xf32>
    "tpu.trace_start"() <{level = 10 : i32, message = "bqd,bkd->bqk"}> : () -> ()
    %cst_30 = arith.constant dense<0.000000e+00> : vector<2x8x8xf32>
    %54 = tpu.matmul %49, %51, %cst_30 {dimension_numbers = #tpu.dot_dimension_numbers<[2], [2], [1], [1], [0, 0, 0, 1, 1, 1], [0], [0]>} : vector<2x8x8xf32>, vector<2x8x8xf32>, vector<2x8x8xf32> -> vector<2x8x8xf32>
    "tpu.trace_stop"() : () -> ()
    %cst_31 = arith.constant dense<0xFF800000> : vector<2x8xf32>
    %55 = vector.multi_reduction <maximumf>, %54, %cst_31 [2] : vector<2x8x8xf32> to vector<2x8xf32>
    %56 = vector.shape_cast %55 : vector<2x8xf32> to vector<2x8x1xf32>
    %57 = vector.broadcast %56 : vector<2x8x1xf32> to vector<2x8x8xf32>
    %58 = arith.subf %54, %57 : vector<2x8x8xf32>
    %59 = math.exp %58 : vector<2x8x8xf32>
    %cst_32 = arith.constant dense<0.000000e+00> : vector<2x8xf32>
    %60 = vector.multi_reduction <add>, %59, %cst_32 [2] : vector<2x8x8xf32> to vector<2x8xf32>
    %61 = vector.shape_cast %60 : vector<2x8xf32> to vector<2x8x1xf32>
    %62 = tpu.reciprocal %61 {approx = true} : vector<2x8x1xf32> -> vector<2x8x1xf32>
    %63 = vector.broadcast %62 : vector<2x8x1xf32> to vector<2x8x8xf32>
    %64 = arith.mulf %59, %63 : vector<2x8x8xf32>
    "tpu.trace_start"() <{level = 10 : i32, message = "bqk,bkd->bqd"}> : () -> ()
    %cst_33 = arith.constant dense<0.000000e+00> : vector<2x8x8xf32>
    %65 = tpu.matmul %64, %53, %cst_33 {dimension_numbers = #tpu.dot_dimension_numbers<[2], [1], [1], [2], [0, 0, 0, 1, 1, 2], [0], [0]>} : vector<2x8x8xf32>, vector<2x8x8xf32>, vector<2x8x8xf32> -> vector<2x8x8xf32>
    "tpu.trace_stop"() : () -> ()
    %66 = vector.shape_cast %65 : vector<2x8x8xf32> to vector<16x8xf32>
    %c0_34 = arith.constant 0 : index
    %c16_35 = arith.constant 16 : index
    %67 = vector.load %arg8[%c0_34, %c16_35] : memref<16x32xf32, #tpu.memory_space<vmem>>, vector<16x8xf32>
    tpu.vector_store %arg8[%c0_34, %c16_35], %66 {strides = array<i32>} : memref<16x32xf32, #tpu.memory_space<vmem>>, vector<16x8xf32>,
    %c0_36 = arith.constant 0 : index
    %c24 = arith.constant 24 : index
    %68 = vector.load %arg7[%c0_36, %c24] : memref<16x96xf32, #tpu.memory_space<vmem>>, vector<16x8xf32>
    %69 = vector.shape_cast %68 : vector<16x8xf32> to vector<2x8x8xf32>
    %c0_37 = arith.constant 0 : index
    %c56 = arith.constant 56 : index
    %70 = vector.load %arg7[%c0_37, %c56] : memref<16x96xf32, #tpu.memory_space<vmem>>, vector<16x8xf32>
    %71 = vector.shape_cast %70 : vector<16x8xf32> to vector<2x8x8xf32>
    %c0_38 = arith.constant 0 : index
    %c88 = arith.constant 88 : index
    %72 = vector.load %arg7[%c0_38, %c88] : memref<16x96xf32, #tpu.memory_space<vmem>>, vector<16x8xf32>
    %73 = vector.shape_cast %72 : vector<16x8xf32> to vector<2x8x8xf32>
    "tpu.trace_start"() <{level = 10 : i32, message = "bqd,bkd->bqk"}> : () -> ()
    %cst_39 = arith.constant dense<0.000000e+00> : vector<2x8x8xf32>
    %74 = tpu.matmul %69, %71, %cst_39 {dimension_numbers = #tpu.dot_dimension_numbers<[2], [2], [1], [1], [0, 0, 0, 1, 1, 1], [0], [0]>} : vector<2x8x8xf32>, vector<2x8x8xf32>, vector<2x8x8xf32> -> vector<2x8x8xf32>
    "tpu.trace_stop"() : () -> ()
    %cst_40 = arith.constant dense<0xFF800000> : vector<2x8xf32>
    %75 = vector.multi_reduction <maximumf>, %74, %cst_40 [2] : vector<2x8x8xf32> to vector<2x8xf32>
    %76 = vector.shape_cast %75 : vector<2x8xf32> to vector<2x8x1xf32>
    %77 = vector.broadcast %76 : vector<2x8x1xf32> to vector<2x8x8xf32>
    %78 = arith.subf %74, %77 : vector<2x8x8xf32>
    %79 = math.exp %78 : vector<2x8x8xf32>
    %cst_41 = arith.constant dense<0.000000e+00> : vector<2x8xf32>
    %80 = vector.multi_reduction <add>, %79, %cst_41 [2] : vector<2x8x8xf32> to vector<2x8xf32>
    %81 = vector.shape_cast %80 : vector<2x8xf32> to vector<2x8x1xf32>
    %82 = tpu.reciprocal %81 {approx = true} : vector<2x8x1xf32> -> vector<2x8x1xf32>
    %83 = vector.broadcast %82 : vector<2x8x1xf32> to vector<2x8x8xf32>
    %84 = arith.mulf %79, %83 : vector<2x8x8xf32>
    "tpu.trace_start"() <{level = 10 : i32, message = "bqk,bkd->bqd"}> : () -> ()
    %cst_42 = arith.constant dense<0.000000e+00> : vector<2x8x8xf32>
    %85 = tpu.matmul %84, %73, %cst_42 {dimension_numbers = #tpu.dot_dimension_numbers<[2], [1], [1], [2], [0, 0, 0, 1, 1, 2], [0], [0]>} : vector<2x8x8xf32>, vector<2x8x8xf32>, vector<2x8x8xf32> -> vector<2x8x8xf32>
    "tpu.trace_stop"() : () -> ()
    %86 = vector.shape_cast %85 : vector<2x8x8xf32> to vector<16x8xf32>
    %c0_43 = arith.constant 0 : index
    %c24_44 = arith.constant 24 : index
    %87 = vector.load %arg8[%c0_43, %c24_44] : memref<16x32xf32, #tpu.memory_space<vmem>>, vector<16x8xf32>
    tpu.vector_store %arg8[%c0_43, %c24_44], %86 {strides = array<i32>} : memref<16x32xf32, #tpu.memory_space<vmem>>, vector<16x8xf32>,
    %c0_45 = arith.constant 0 : index
    %c0_46 = arith.constant 0 : index
    %88 = vector.load %arg8[%c0_45, %c0_46] : memref<16x32xf32, #tpu.memory_space<vmem>>, vector<16x32xf32>
    %c0_47 = arith.constant 0 : index
    %c0_48 = arith.constant 0 : index
    %89 = vector.load %arg4[%c0_47, %c0_48] : memref<32x32xf32, #tpu.memory_space<vmem>>, vector<32x32xf32>
    %cst_49 = arith.constant dense<0.000000e+00> : vector<16x32xf32>
    %90 = tpu.matmul %88, %89, %cst_49 {dimension_numbers = #tpu.dot_dimension_numbers<[1], [0], [0], [1], [0, 0, 1, 1], [], []>} : vector<16x32xf32>, vector<32x32xf32>, vector<16x32xf32> -> vector<16x32xf32>
    %c0_50 = arith.constant 0 : index
    %c0_51 = arith.constant 0 : index
    %91 = vector.load %arg5[%c0_50, %c0_51] : memref<1x32xf32, #tpu.memory_space<vmem>>, vector<1x32xf32>
    %92 = vector.broadcast %91 : vector<1x32xf32> to vector<16x32xf32>
    %93 = arith.addf %90, %92 : vector<16x32xf32>
    %94 = vector.shape_cast %93 : vector<16x32xf32> to vector<2x8x32xf32>
    %c0_52 = arith.constant 0 : index
    %c0_53 = arith.constant 0 : index
    %c0_54 = arith.constant 0 : index
    %95 = vector.load %arg6[%c0_52, %c0_53, %c0_54] : memref<2x8x32xf32, #tpu.memory_space<vmem>>, vector<2x8x32xf32>
    tpu.vector_store %arg6[%c0_52, %c0_53, %c0_54], %94 {strides = array<i32>} : memref<2x8x32xf32, #tpu.memory_space<vmem>>, vector<2x8x32xf32>,
    return
  }
  func.func @transform_0(%arg0: i32) -> (i32, i32, i32) {
    %c0_i32 = arith.constant 0 : i32
    %c0_i32_0 = arith.constant 0 : i32
    %c0_i32_1 = arith.constant 0 : i32
    return %arg0, %c0_i32, %c0_i32_0 : i32, i32, i32
  }
  func.func @transform_1(%arg0: i32) -> (i32, i32) {
    %c0_i32 = arith.constant 0 : i32
    %c0_i32_0 = arith.constant 0 : i32
    %c0_i32_1 = arith.constant 0 : i32
    return %c0_i32, %c0_i32_0 : i32, i32
  }
  func.func @transform_2(%arg0: i32) -> (i32, i32) {
    %c0_i32 = arith.constant 0 : i32
    %c0_i32_0 = arith.constant 0 : i32
    %c0_i32_1 = arith.constant 0 : i32
    return %c0_i32, %c0_i32_0 : i32, i32
  }
  func.func @transform_3(%arg0: i32) -> (i32, i32) {
    %c0_i32 = arith.constant 0 : i32
    %c0_i32_0 = arith.constant 0 : i32
    %c0_i32_1 = arith.constant 0 : i32
    return %c0_i32, %c0_i32_0 : i32, i32
  }
  func.func @transform_4(%arg0: i32) -> (i32, i32) {
    %c0_i32 = arith.constant 0 : i32
    %c0_i32_0 = arith.constant 0 : i32
    %c0_i32_1 = arith.constant 0 : i32
    return %c0_i32, %c0_i32_0 : i32, i32
  }
  func.func @transform_5(%arg0: i32) -> (i32, i32, i32) {
    %c0_i32 = arith.constant 0 : i32
    %c0_i32_0 = arith.constant 0 : i32
    %c0_i32_1 = arith.constant 0 : i32
    return %arg0, %c0_i32, %c0_i32_0 : i32, i32, i32
  }
}

</mosaic_0001>

<bundles_post_ra>
// kernel: tpu_custom_call.1
= control target key start
LH: loop header
LB: loop body
LE: loop exit
PB: predicated region body
PF: predicated region fallthrough
CT: control target
= control target key end

     0   :  { %10 = vsyncpa [#allocation5], 0  ;;  %s3040_s0 = inlined_call_operand.hbm [shape: f32[4,8,32], index: 0, kind: input, shape index: {}]   ;;  %s3041_s1 = inlined_call_operand.hbm [shape: f32[32,96], index: 1, kind: input, shape index: {}]   ;;  %s3042_s2 = inlined_call_operand.hbm [shape: f32[1,96], index: 2, kind: input, shape index: {}]   ;;  %s3043_s3 = inlined_call_operand.hbm [shape: f32[32,32], index: 3, kind: input, shape index: {}]   ;;  %s3044_s4 = inlined_call_operand.hbm [shape: f32[1,32], index: 4, kind: input, shape index: {}]   ;;  %s3045_s5 = inlined_call_operand.hbm [shape: f32[4,8,32], index: 5, kind: output, shape index: {}]  }
   0x1   :  { %12 = vsyncpa [#allocation5 + $0x1], 0 }
   0x2   :  { %13 = vsyncpa [#allocation8], 0 }
   0x3   :  { %14 = vsyncpa [#allocation11], 0 }
   0x4   :  { %15 = vsyncpa [#allocation6], 0 }
   0x5   :  { %17 = vsyncpa [#allocation6 + $0x1], 0  ;;  %s2613_s18 = smov 0   ;;  %s2615_s19 = smov 0  }
   0x6   :  { %s2617_s20 = smov 0   ;;  %s2619_s21 = smov 0  }
   0x7 LB: > { %s2634_s22 = sadd.s32 4294967295, %s2556_s21   ;;  %s1986_s23 = sadd.s32 4294967294, %s2556_s21   ;;  %s2556_s21 = sphi %s2619_s21, %s3068_s21   ;;  %s2552_s20 = sphi %s2617_s20, %s3067_s20   ;;  %s2548_s19 = sphi %s2615_s19, %s3066_s19   ;;  %s2544_s18 = sphi %s2613_s18, %s3065_s18  }
   0x8   : > { %p43_p0 = scmp.ne.s32.totalorder %s2548_s19, %s2544_s18  ;;  %p3046_p1 = scmp.eq.s32.totalorder %s2634_s22, 0 }
   0x9   : > { %p157_p3 = scmp.eq.s32.totalorder %s1986_s23, 1  ;;  %p1987_p5 = scmp.ge.s32.totalorder %s2556_s21, 1 }
   0xa   : > { %p2643_p4 = por %p3046_p1, %p43_p0  ;;  %p164_p7 = scmp.lt.s32.totalorder %s2556_s21, 3 }
   0xb   : > { %p2648_p6 = por %p157_p3, %p43_p0  ;;  %s2558_s27 = smov [#allocation7]  }
   0xc   : > { %s3049_s24 = scalar_select %p2643_p4, 1, 0 }
   0xd   : > { %s3050_s25 = scalar_select %p2648_p6, 1, 0 }
   0xe   : > { %p2653_p8 = pnand %p1987_p5, %p164_p7  ;;  %s176_s28 = sshll.u32 %s2558_s27, 4  ;;  %s2657_s28 = int_to_ptr.vmem [resolvable:$true] %s176_s28 }
   0xf   : > { %s2559_s30 = smov [#allocation10]   ;;  %s2560_s7 = smov [#allocation9]  }
  0x10   : > { %s3051_s26 = scalar_select %p2653_p8, 1, 0 }
  0x11   : > { %p2222_p9 = pneg %p2653_p8  ;;  %s200_s6 = sshll.u32 %s2559_s30, 4  ;;  %s2668_s6 = int_to_ptr.vmem [resolvable:$true] %s200_s6 }
  0x12   : > { %s2670_s8 = sshll.u32 %s2560_s7, 4  ;;  %s2340_s11 = scalar_lea.hbm %s3041_s1, 512  ;;  %s191_s8 = int_to_ptr.vmem [resolvable:$true] %s2670_s8 }
  0x13   : > { %p2664_p11 = pnand %p2222_p9, %p3046_p1  ;;  %p2341_p12 = scmp.ne.s32.totalorder %s3041_s1, %s2340_s11 }
  0x14   : > { %p2347_p5 = scmp.lt.u32.totalorder %s2340_s11, %s3041_s1 }
  0x15   : > { %p2680_p13 = pneg %p2664_p11 }
  0x17   : > { %p2343_p0 = pnand %p2680_p13, %p2341_p12 }
  0x19   : > { %p2344_p3 = pneg %p2343_p0 }
  0x1b   : > { %p2349_p7 = pnand %p2347_p5, %p2344_p3 }
  0x1d   : > { %2352 = shalt.err (!%p2349_p7)
}
  0x1e   : > { %s2353_s17 = scalar_lea.vmem %s2657_s28, 512  ;;  %p2361_p2 = scmp.lt.s32.totalorder %s2657_s28, %s2657_s28 }
  0x1f   : > { %p2354_p9 = scmp.ne.s32.totalorder %s2657_s28, %s2353_s17  ;;  %p2362_p6 = scmp.lt.s32.totalorder %s2353_s17, %s2353_s17 }
  0x21   : > { %p2356_p10 = pnand %p2354_p9, %p2680_p13  ;;  %p2363_p12 = por %p2362_p6, %p2361_p2 }
  0x23   : > { %p2357_p1 = pneg %p2356_p10 }
  0x25   : > { %p2364_p0 = pnand %p2363_p12, %p2357_p1 }
  0x27   : > { %2367 = shalt.err (!%p2364_p0)
}
  0x28   : > { %s2561_s23 = smov 128   ;;  %s2562_s27 = smov 8  }
  0x29   : > { %2225 = dma.hbm_to_vmem [thread:$0]  (!%p2664_p11), %s3041_s1, 512, %s2657_s28, [#allocation8], %s2561_s23, %s2561_s23, %s2562_s27  }
  0x2a   : > { %s2368_s11 = scalar_lea.hbm %s3043_s3, 512 }
  0x2b   : > { %p2369_p1 = scmp.ne.s32.totalorder %s3043_s3, %s2368_s11  ;;  %p2375_p10 = scmp.lt.u32.totalorder %s2368_s11, %s3043_s3 }
  0x2d   : > { %p2371_p2 = pnand %p2369_p1, %p2680_p13 }
  0x2f   : > { %p2372_p6 = pneg %p2371_p2 }
  0x31   : > { %p2377_p3 = pnand %p2375_p10, %p2372_p6 }
  0x33   : > { %2380 = shalt.err (!%p2377_p3)
}
  0x34   : > { %s2381_s28 = scalar_lea.vmem %s2668_s6, 512  ;;  %p2389_p12 = scmp.lt.s32.totalorder %s2668_s6, %s2668_s6 }
  0x35   : > { %p2382_p5 = scmp.ne.s32.totalorder %s2668_s6, %s2381_s28  ;;  %p2390_p0 = scmp.lt.s32.totalorder %s2381_s28, %s2381_s28 }
  0x37   : > { %p2384_p7 = pnand %p2382_p5, %p2680_p13  ;;  %p2391_p1 = por %p2390_p0, %p2389_p12 }
  0x39   : > { %p2385_p9 = pneg %p2384_p7 }
  0x3b   : > { %p2392_p2 = pnand %p2391_p1, %p2385_p9 }
  0x3d   : > { %2395 = shalt.err (!%p2392_p2)
}
  0x3e   : > { %2231 = dma.hbm_to_vmem [thread:$0]  (!%p2664_p11), %s3043_s3, 512, %s2668_s6, [#allocation11], %s2561_s23, %s2561_s23, %s2562_s27  }
  0x3f   : > { %s2396_s10 = scalar_lea.hbm %s3042_s2, 16 }
  0x40   : > { %p2397_p6 = scmp.ne.s32.totalorder %s3042_s2, %s2396_s10  ;;  %p2403_p5 = scmp.lt.u32.totalorder %s2396_s10, %s3042_s2 }
  0x42   : > { %p2399_p10 = pnand %p2397_p6, %p2680_p13 }
  0x44   : > { %p2400_p3 = pneg %p2399_p10 }
  0x46   : > { %p2405_p7 = pnand %p2403_p5, %p2400_p3 }
  0x48   : > { %2408 = shalt.err (!%p2405_p7)
}
  0x49   : > { %s2409_s16 = scalar_lea.vmem %s191_s8, 16  ;;  %s2416_s6 = scalar_lea.vmem %s191_s8, 32 }
  0x4a   : > { %p2410_p9 = scmp.ne.s32.totalorder %s191_s8, %s2409_s16  ;;  %p2417_p1 = scmp.lt.s32.totalorder %s191_s8, %s191_s8 }
  0x4b   : > { %p2418_p2 = scmp.lt.s32.totalorder %s2416_s6, %s2409_s16 }
  0x4c   : > { %p2412_p12 = pnand %p2410_p9, %p2680_p13 }
  0x4d   : > { %p2419_p4 = por %p2418_p2, %p2417_p1 }
  0x4e   : > { %p2413_p0 = pneg %p2412_p12 }
  0x50   : > { %p2420_p8 = pnand %p2419_p4, %p2413_p0 }
  0x52   : > { %2423 = shalt.err (!%p2420_p8)
}
  0x53   : > { %2228 = dma.hbm_to_vmem [thread:$0]  (!%p2664_p11), %s3042_s2, 16, %s191_s8, [#allocation8]  }
  0x54   : > { %s2563_s30 = smov [#allocation12]   ;;  %s2424_s11 = scalar_lea.hbm %s3044_s4, 16 }
  0x55   : > { %s214_s7 = sshll.u32 %s2563_s30, 4  ;;  %p2425_p6 = scmp.ne.s32.totalorder %s3044_s4, %s2424_s11  ;;  %s215_s7 = int_to_ptr.vmem [resolvable:$true] %s214_s7 }
  0x56   : > { %p2431_p10 = scmp.lt.u32.totalorder %s2424_s11, %s3044_s4 }
  0x57   : > { %p2427_p4 = pnand %p2425_p6, %p2680_p13 }
  0x59   : > { %p2428_p8 = pneg %p2427_p4 }
  0x5b   : > { %p2433_p3 = pnand %p2431_p10, %p2428_p8 }
  0x5d   : > { %2436 = shalt.err (!%p2433_p3)
}
  0x5e   : > { %s2437_s8 = scalar_lea.vmem %s215_s7, 16  ;;  %s2444_s6 = scalar_lea.vmem %s215_s7, 32 }
  0x5f   : > { %p2438_p5 = scmp.ne.s32.totalorder %s215_s7, %s2437_s8  ;;  %p2445_p12 = scmp.lt.s32.totalorder %s215_s7, %s215_s7 }
  0x60   : > { %p2446_p0 = scmp.lt.s32.totalorder %s2444_s6, %s2437_s8 }
  0x61   : > { %p2440_p7 = pnand %p2438_p5, %p2680_p13 }
  0x62   : > { %p2447_p1 = por %p2446_p0, %p2445_p12 }
  0x63   : > { %p2441_p9 = pneg %p2440_p7 }
  0x65   : > { %p2448_p2 = pnand %p2447_p1, %p2441_p9 }
  0x67   : > { %2451 = shalt.err (!%p2448_p2)
}
  0x68   : > { %2234 = dma.hbm_to_vmem [thread:$0]  (!%p2664_p11), %s3044_s4, 16, %s215_s7, [#allocation11]  }
  0x69   : > { %s2768_s14 = sadd.s32 1, %s2556_s21   ;;  %s30_s30 = sadd.s32 1, %s2552_s20 }
  0x6a   : > { %s27_s29 = ssub.s32 %s2556_s21, %s2768_s14  ;;  %p37_p13 = scmp.ne.s32.totalorder %s2552_s20, %s2548_s19 }
  0x6b   : > { %p28_p6 = scmp.eq.s32.totalorder %s27_s29, 0  ;;  %p38_p4 = scmp.eq.s32.totalorder %s2556_s21, 0 }
  0x6c   : > { %p3054_p8 = scmp.eq.s32.totalorder %s2634_s22, 1  ;;  %p2247_p3 = scmp.lt.s32.totalorder %s2556_s21, 2 }
  0x6d   : > { %s2784_s10 = scalar_select %p28_p6, %s2552_s20, %s30_s30  }
  0x6e   : > { %p2778_p10 = por %p3054_p8, %p37_p13  ;;  %p39_p5 = por %p38_p4, %p37_p13 }
  0x6f   : > { %s225_s11 = sand.u32 1, %s2552_s20   ;;  %s2038_s7 = sshll.u32 %s2556_s21, 8 }
  0x70   : > { %s1993_s12 = sshll.u32 %s225_s11, 4  ;;  %s2791_s16 = scalar_lea.hbm %s3040_s0, %s2038_s7 }
  0x71   : > { %s229_s8 = scalar_lea.vmem [#allocation4], %s1993_s12  ;;  %p2795_p11 = pnand %p2247_p3, %p39_p5 }
  0x72   : > { %s236_s6 = sshll.u32 %s229_s8, 4  ;;  %s2799_s17 = scalar_lea.sflag [#allocation5], %s225_s11  ;;  %s2793_s6 = int_to_ptr.vmem [resolvable:$true] %s236_s6 }
  0x73   : > { %s2452_s30 = scalar_lea.hbm %s2791_s16, 256  ;;  %p2454_p9 = pneg %p2795_p11 }
  0x74   : > { %p2453_p7 = scmp.ne.s32.totalorder %s2791_s16, %s2452_s30  ;;  %s2457_s7 = scalar_lea.hbm %s3040_s0, 512 }
  0x75   : > { %p2458_p1 = scmp.lt.u32.totalorder %s2791_s16, %s3040_s0  ;;  %p2459_p2 = scmp.lt.u32.totalorder %s2457_s7, %s2452_s30 }
  0x76   : > { %p2455_p12 = pnand %p2454_p9, %p2453_p7  ;;  %p2461_p6 = scmp.lt.u32.totalorder %s2452_s30, %s2791_s16 }
  0x77   : > { %p2460_p13 = por %p2459_p2, %p2458_p1 }
  0x78   : > { %p2456_p0 = pneg %p2455_p12 }
  0x79   : > { %p2462_p4 = por %p2461_p6, %p2460_p13 }
  0x7b   : > { %p2463_p8 = pnand %p2462_p4, %p2456_p0 }
  0x7d   : > { %2466 = shalt.err (!%p2463_p8)
}
  0x7e   : > { %s2467_s11 = scalar_lea.vmem %s2793_s6, 256  ;;  %s2564_s8 = smov [#allocation4]  }
  0x7f   : > { %p2468_p3 = scmp.ne.s32.totalorder %s2793_s6, %s2467_s11  ;;  %s2472_s29 = sshll.u32 %s2564_s8, 4  ;;  %s2473_s29 = int_to_ptr.vmem [resolvable:$false] %s2472_s29 }
  0x80   : > { %s2474_s12 = scalar_lea.vmem %s2473_s29, 512  ;;  %p2475_p12 = scmp.lt.s32.totalorder %s2793_s6, %s2473_s29 }
  0x81   : > { %p2470_p5 = pnand %p2468_p3, %p2454_p9  ;;  %p2476_p1 = scmp.lt.s32.totalorder %s2474_s12, %s2467_s11 }
  0x83   : > { %p2471_p7 = pneg %p2470_p5  ;;  %p2477_p2 = por %p2476_p1, %p2475_p12 }
  0x85   : > { %p2478_p13 = pnand %p2477_p2, %p2471_p7 }
  0x87   : > { %2481 = shalt.err (!%p2478_p13)
}
  0x88   : > { %2238 = dma.hbm_to_vmem [thread:$0]  (!%p2795_p11), %s2791_s16, 256, %s2793_s6, %s2799_s17, %s2561_s23, %s2561_s23, %s2562_s27  }
  0x89   : > { %p3057_p9 = scmp.ne.s32.totalorder %s3051_s26, 0 }
  0x8a   : > { %s2833_s30 = sand.u32 (!%p3057_p9), 1, %s2548_s19   ;;  %p3058_p0 = scmp.ne.s32.totalorder (!%p3057_p9), %s3049_s24, 0 }
  0x8b   : > { %248 = sbr.rel (%p3057_p9) target bundleno = 3235 (0xca3), region = 40  ;;  %s1997_s7 = sshll.u32 (!%p3057_p9), %s2833_s30, 4 }
  0x8c   : > { %s251_s13 = scalar_lea.sflag (!%p3057_p9), [#allocation5], %s2833_s30  ;;  %s254_s28 = scalar_lea.vmem (!%p3057_p9), [#allocation4], %s1997_s7 }
  0x92   : > { %2527 = dma.done.wait (%p3058_p0), %s251_s13, 256  }
  0x93   : > { %2529 = vsyncadd (%p3058_p0), %s251_s13, 4294967040  ;;  %p3059_p11 = scmp.eq.s32.totalorder %s2634_s22, 0 }
  0x95   : > { %2531 = dma.done.wait (%p3059_p11), [#allocation8], 528   ;;  %p3060_p6 = pmov %p3059_p11 }
  0x97   : > { %2533 = vsyncadd (%p3060_p6), [#allocation8], 4294966768  ;;  %p3061_p4 = pmov %p3060_p6 }
  0x99   : > { %2535 = dma.done.wait (%p3061_p4), [#allocation11], 528   ;;  %p3062_p8 = pmov %p3061_p4 }
  0x9a   : > { %vm312_vm0 = vcmask 261120   ;;  %v301_v0 = vld [vmem:[#allocation7] sm:$0xff]  ;;  %v302_v1 = vld [vmem:[#allocation7 + $0x8] sm:$0xff]  ;;  %v303_v2 = vld [vmem:[#allocation7 + $0x10] sm:$0xff]  ;;  %v2565_v8 = vmov 0.0   ;;  %vm394_vm1 = vcmask 785408  }
  0x9b   : > { %2537 = vsyncadd (%p3062_p8), [#allocation11], 4294966768  ;;  %v2186_v3 = vpack.c.bf16 %v302_v1, %v301_v0  ;;  %v304_v4 = vld [vmem:[#allocation7 + $0x18] sm:$0xff]  ;;  %v299_v5 = vld [vmem:[%s254_s28] sm:$0xff]  ;;  %2095 = vmatprep.subr.mxu1 %v2565_v8  ;;  %vm2566_vm2 = vmmov 0   ;;  %s2567_s24 = smov 96  }
  0x9c   : > { %v2190_v6 = vpack.c.bf16 %v304_v4, %v303_v2  ;;  %2092 = vmatprep.mubr.msk.f32.mxu0 %vm312_vm0, %v299_v5  ;;  %v300_v7 = vld [vmem:[%s254_s28 + $0x8] sm:$0xff]  ;;  %v2003_v9 = vld [vmem:[#allocation9] ss:$0 sm:$0xff]  ;;  %2097 = vmatprep.mubr.msk.f32.mxu1 %vm2566_vm2, %v2565_v8  ;;  %vm402_vm3 = vcmask 64512   ;;  %s2568_s26 = smov 64   ;;  %s2569_s23 = smov 88  }
  0x9d   : > { %2187 = vmatprep.subr.bf16.mxu0 %v2186_v3  ;;  %s2570_s27 = smov 120   ;;  %s2571_s16 = smov 56   ;;  %vm1072_vm4 = vcmask 130112   ;;  %vm1417_vm5 = vcmask 195712   ;;  %vm1762_vm6 = vcmask 261312  }
  0x9e   : > { %2189 = vmatpush3.bf16.msra.mxu0 %v2186_v3  ;;  %s2572_s6 = smov 112   ;;  %s2573_s17 = smov 80  }
  0x9f   : > { %2191 = vmatprep.subr.bf16.mxu0 %v2190_v6  ;;  %s2574_s15 = smov 48   ;;  %s2575_s11 = smov 72  }
  0xa0   : > { %s2576_s8 = smov 104   ;;  %s2577_s29 = smov 40  }
  0xa1   : > { %s2578_s12 = smov 8   ;;  %s2579_s13 = smov 16  }
  0xa2   : > { %2193 = vmatpush3.bf16.msra.mxu0 %v2190_v6  ;;  %s2580_s28 = smov 24  }
  0xa3   : > { %2115 = vmatprep.subr.mxu0 %v2565_v8 }
  0xa5   : > { %2093 = vmatmul.mubr.msk.f32.vlgmr.msra.gmra.mrb[0].mxu0 %vm312_vm0, %v300_v7 }
  0xa6   : > { %2117 = vmatprep.mubr.msk.f32.mxu0 %vm2566_vm2, %v2565_v8 }
 0x178   : > { %v2094_v10 = vpop.f32.mrb[0].mxu0 }
 0x179   : > { %v391_v11 = vadd.f32 %v2094_v10, %v2003_v9  ;;  %v385_v12 = vpop.f32.mrb[1].mxu0 }
 0x17a   : > { %v386_v13 = vadd.f32 %v2003_v9, %v385_v12 }
 0x17b   : > { %396 = vst.msk [vmem:[#allocation2 + $0x8] sm:$0xff] %vm394_vm1, %v391_v11 }
 0x17c   : > { %395 = vst.msk [vmem:[#allocation2] sm:$0xff] %vm394_vm1, %v386_v13 }
 0x182   : > { %v2862_v15 = vld [vmem:[#allocation2 + $0x8] sm:$0xff] }
 0x183   : > { %v2859_v14 = vld [vmem:[#allocation2] sm:$0xff] }
 0x184   : > { %400 = vrot.lane.b32.xlu0 %v2859_v14, %s2567_s24 }
 0x188   : > { %478 = vrot.lane.b32.xlu0 %v2862_v15, %s2567_s24  ;;  %s296_s24 = scalar_lea.vmem [#allocation13], %s1997_s7  ;;  %s1862_s7 = scalar_lea.sflag [#allocation6], %s2833_s30 }
 0x1f6   : > { %v401_v16 = vpop.permute.xlu0 %400 }
 0x1f7   : > { %2096 = vmatpush3.xpose.msk.msra.mxu1 %vm402_vm3, %v401_v16 }
 0x1f8   : > { %2100 = vmatprep.subr.mxu1 %v2565_v8 }
 0x1fa   : > { %2098 = vmatmul.mubr.msk.f32.vlgmr.msra.gmra.mrb[0].mxu1 %vm402_vm3, %v2859_v14  ;;  %v479_v17 = vpop.permute.xlu0 %478 }
 0x1fb   : > { %2101 = vmatpush3.xpose.msk.msra.mxu1 %vm402_vm3, %v479_v17  ;;  %2102 = vmatprep.mubr.msk.f32.mxu1 %vm2566_vm2, %v2565_v8 }
 0x1fc   : > { %2105 = vmatprep.subr.mxu1 %v2565_v8 }
 0x1fe   : > { %2103 = vmatmul.mubr.msk.f32.vlgmr.msra.gmra.mrb[2].mxu1 %vm402_vm3, %v2862_v15 }
 0x1ff   : > { %2107 = vmatprep.mubr.msk.f32.mxu1 %vm2566_vm2, %v2565_v8 }
 0x2cd   : > { %v473_v18 = vpop.f32.mrb[0].mxu1 }
 0x2ce   : > { %v2099_v19 = vpop.f32.mrb[1].mxu1  ;;  %v554_v20 = vsel %vm402_vm3, %v473_v18, -inf }
 0x2cf   : > { %555 = vmax.xlane.f32.xlu1 %v554_v20 }
 0x2d1   : > { %v550_v21 = vpop.f32.mrb[2].mxu1 }
 0x2d2   : > { %v2104_v22 = vpop.f32.mrb[3].mxu1  ;;  %v557_v23 = vsel %vm402_vm3, %v550_v21, -inf }
 0x2d3   : > { %558 = vmax.xlane.f32.xlu1 %v557_v23 }
 0x2e4   : > { %576 = vrot.lane.b32.xlu1 %v2859_v14, %s2568_s26 }
 0x2e8   : > { %652 = vrot.lane.b32.xlu1 %v2862_v15, %s2568_s26  ;;  %s1875_s26 = sshll.u32 %s296_s24, 4  ;;  %s2988_s26 = int_to_ptr.vmem [resolvable:$true] %s1875_s26 }
 0x2ec   : > { %735 = vrot.lane.b32.xlu1 %v2859_v14, %s2569_s23 }
 0x2f0   : > { %814 = vrot.lane.b32.xlu1 %v2862_v15, %s2569_s23  ;;  %s2039_s23 = sshll.u32 %s2634_s22, 8  ;;  %s2482_s22 = scalar_lea.vmem %s2988_s26, 256 }
 0x2f1   : > { %p2483_p3 = scmp.ne.s32.totalorder %s2988_s26, %s2482_s22 }
 0x2f3   : > { %p2484_p5 = pnand %p2483_p3, %p2778_p10 }
 0x2f5   : > { %p2485_p7 = pneg %p2484_p5 }
 0x35c   : > { %v556_v24 = vpop.xlane.xlu1 %555 }
 0x35d   : > { %v560_v25 = vsub.f32 %v473_v18, %v556_v24 }
 0x35f   : > { %v562_v26 = vmul.f32 1.442695, %v560_v25 }
 0x360   : > { %v559_v27 = vpop.xlane.xlu1 %558 }
 0x361   : > { %2308 = vpow2.f32 %v562_v26  ;;  %v561_v28 = vsub.f32 %v550_v21, %v559_v27 }
 0x363   : > { %v564_v29 = vmul.f32 1.442695, %v561_v28 }
 0x364   : > { %v577_v30 = vpop.permute.xlu1 %576 }
 0x365   : > { %2310 = vpow2.f32 %v564_v29  ;;  %2106 = vmatpush3.msra.mxu1 %v577_v30 }
 0x366   : > { %2110 = vmatprep.subr.mxu1 %v2565_v8 }
 0x368   : > { %v653_v31 = vpop.permute.xlu1 %652 }
 0x36b   : > { %v2309_v32 = vpop.eup %2308 }
 0x36c   : > { %v736_v33 = vpop.permute.xlu1 %735  ;;  %v566_v34 = vsel %vm402_vm3, %v2309_v32, 0.0 }
 0x36d   : > { %567 = vadd.xlane.f32.xlu0 %v566_v34  ;;  %2116 = vmatpush3.xpose.msk.msra.mxu0 %vm402_vm3, %v736_v33 }
 0x36e   : > { %2125 = vmatprep.subr.mxu0 %v2565_v8 }
 0x36f   : > { %v2311_v35 = vpop.eup %2310 }
 0x370   : > { %v569_v36 = vsel %vm402_vm3, %v2311_v35, 0.0  ;;  %v815_v37 = vpop.permute.xlu1 %814 }
 0x371   : > { %570 = vadd.xlane.f32.xlu1 %v569_v36 }
 0x382   : > { %812 = vrot.lane.b32.xlu1 %v2862_v15, %s2570_s27 }
 0x383   : > { %733 = vrot.lane.b32.xlu0 %v2859_v14, %s2570_s27 }
 0x3fa   : > { %v568_v38 = vpop.xlane.xlu0 %567 }
 0x3fb   : > { %2312 = vrcp.f32 %v568_v38 }
 0x3fe   : > { %v571_v39 = vpop.xlane.xlu1 %570  ;;  %v734_v40 = vpop.permute.xlu0 %733 }
 0x3ff   : > { %2314 = vrcp.f32 %v571_v39  ;;  %2118 = vmatmul.mubr.msk.f32.vlgmr.msra.gmra.mrb[2].mxu0 %vm402_vm3, %v734_v40 }
 0x400   : > { %2127 = vmatprep.mubr.msk.f32.mxu0 %vm2566_vm2, %v2565_v8 }
 0x402   : > { %v813_v45 = vpop.permute.xlu1 %812 }
 0x405   : > { %v2313_v41 = vpop.eup %2312 }
 0x406   : > { %v574_v42 = vmul.f32 %v2313_v41, %v2309_v32 }
 0x408   : > { %2108 = vmatmul.mubr.msk.f32.vlgmr.msra.gmra.mrb[4].mxu1 %vm402_vm3, %v574_v42 }
 0x409   : > { %v2315_v43 = vpop.eup %2314  ;;  %2111 = vmatpush3.msra.mxu1 %v653_v31  ;;  %2112 = vmatprep.mubr.msk.f32.mxu1 %vm2566_vm2, %v2565_v8 }
 0x40a   : > { %v575_v44 = vmul.f32 %v2315_v43, %v2311_v35  ;;  %2120 = vmatprep.subr.mxu1 %v2565_v8 }
 0x40c   : > { %2113 = vmatmul.mubr.msk.f32.vlgmr.msra.gmra.mrb[6].mxu1 %vm402_vm3, %v575_v44 }
 0x40d   : > { %2122 = vmatprep.mubr.msk.f32.mxu1 %vm2566_vm2, %v2565_v8 }
 0x410   : > { %2121 = vmatpush3.xpose.msk.msra.mxu1 %vm402_vm3, %v815_v37 }
 0x411   : > { %2130 = vmatprep.subr.mxu1 %v2565_v8 }
 0x413   : > { %2123 = vmatmul.mubr.msk.f32.vlgmr.msra.gmra.mrb[8].mxu1 %vm402_vm3, %v813_v45 }
 0x414   : > { %2132 = vmatprep.mubr.msk.f32.mxu1 %vm2566_vm2, %v2565_v8 }
 0x4d2   : > { %v807_v46 = vpop.f32.mrb[2].mxu0 }
 0x4d3   : > { %v2119_v47 = vpop.f32.mrb[3].mxu0  ;;  %v890_v48 = vsel %vm402_vm3, %v807_v46, -inf }
 0x4d4   : > { %891 = vmax.xlane.f32.xlu1 %v890_v48 }
 0x4db   : > { %v648_v49 = vpop.f32.mrb[4].mxu1 }
 0x4dc   : > { %728 = vst.msk [vmem:[#allocation3] sm:$0xff] %vm402_vm3, %v648_v49  ;;  %v2109_v50 = vpop.f32.mrb[5].mxu1 }
 0x4df   : > { %v724_v51 = vpop.f32.mrb[6].mxu1 }
 0x4e0   : > { %729 = vst.msk [vmem:[#allocation3 + $0x8] sm:$0xff] %vm402_vm3, %v724_v51  ;;  %v2114_v52 = vpop.f32.mrb[7].mxu1 }
 0x4e6   : > { %v886_v53 = vpop.f32.mrb[8].mxu1 }
 0x4e7   : > { %v2124_v54 = vpop.f32.mrb[9].mxu1  ;;  %v893_v55 = vsel %vm402_vm3, %v886_v53, -inf }
 0x4e8   : > { %894 = vmax.xlane.f32.xlu0 %v893_v55 }
 0x4fe   : > { %988 = vrot.lane.b32.xlu0 %v2862_v15, %s2571_s16 }
 0x502   : > { %1078 = vrot.lane.b32.xlu0 %v2859_v14, %s2572_s6 }
 0x561   : > { %v892_v56 = vpop.xlane.xlu1 %891 }
 0x562   : > { %v896_v57 = vsub.f32 %v807_v46, %v892_v56 }
 0x564   : > { %v898_v58 = vmul.f32 1.442695, %v896_v57 }
 0x566   : > { %2316 = vpow2.f32 %v898_v58 }
 0x570   : > { %v2317_v59 = vpop.eup %2316 }
 0x571   : > { %v902_v60 = vsel %vm402_vm3, %v2317_v59, 0.0 }
 0x572   : > { %903 = vadd.xlane.f32.xlu1 %v902_v60 }
 0x575   : > { %v895_v61 = vpop.xlane.xlu0 %894 }
 0x576   : > { %v897_v63 = vsub.f32 %v886_v53, %v895_v61 }
 0x578   : > { %v900_v0 = vmul.f32 1.442695, %v897_v63 }
 0x579   : > { %v989_v62 = vpop.permute.xlu0 %988 }
 0x57a   : > { %2131 = vmatpush3.msra.mxu1 %v989_v62  ;;  %2318 = vpow2.f32 %v900_v0 }
 0x57b   : > { %2140 = vmatprep.subr.mxu1 %v2565_v8 }
 0x57d   : > { %v1079_v9 = vpop.permute.xlu0 %1078 }
 0x583   : > { %912 = vrot.lane.b32.xlu1 %v2859_v14, %s2571_s16 }
 0x584   : > { %v2319_v1 = vpop.eup %2318 }
 0x585   : > { %v905_v2 = vsel %vm402_vm3, %v2319_v1, 0.0 }
 0x587   : > { %1080 = vrot.lane.b32.xlu1 %v2859_v14, %s2573_s17 }
 0x58b   : > { %1159 = vrot.lane.b32.xlu1 %v2862_v15, %s2573_s17  ;;  %s2581_s17 = smov [#allocation13]  }
 0x5af   : > { %906 = vadd.xlane.f32.xlu1 %v905_v2 }
 0x5c0   : > { %1157 = vrot.lane.b32.xlu1 %v2862_v15, %s2572_s6  ;;  %s2993_s6 = scalar_lea.hbm %s3045_s5, %s2039_s23 }
 0x5ff   : > { %v904_v3 = vpop.xlane.xlu1 %903 }
 0x600   : > { %2320 = vrcp.f32 %v904_v3 }
 0x603   : > { %v913_v4 = vpop.permute.xlu1 %912 }
 0x604   : > { %2126 = vmatpush3.msra.mxu0 %v913_v4 }
 0x605   : > { %2135 = vmatprep.subr.mxu0 %v2565_v8 }
 0x607   : > { %v1081_v7 = vpop.permute.xlu1 %1080 }
 0x60a   : > { %v2321_v5 = vpop.eup %2320 }
 0x60b   : > { %v910_v6 = vmul.f32 %v2321_v5, %v2317_v59  ;;  %v1160_v10 = vpop.permute.xlu1 %1159 }
 0x60d   : > { %2128 = vmatmul.mubr.msk.f32.vlgmr.msra.gmra.mrb[4].mxu0 %vm402_vm3, %v910_v6 }
 0x60e   : > { %2136 = vmatpush3.xpose.msk.msra.mxu0 %vm402_vm3, %v1081_v7  ;;  %2137 = vmatprep.mubr.msk.f32.mxu0 %vm2566_vm2, %v2565_v8 }
 0x60f   : > { %2145 = vmatprep.subr.mxu0 %v2565_v8 }
 0x611   : > { %2138 = vmatmul.mubr.msk.f32.vlgmr.msra.gmra.mrb[6].mxu0 %vm402_vm3, %v1079_v9 }
 0x612   : > { %2147 = vmatprep.mubr.msk.f32.mxu0 %vm2566_vm2, %v2565_v8 }
 0x63c   : > { %v907_v11 = vpop.xlane.xlu1 %906 }
 0x63d   : > { %2322 = vrcp.f32 %v907_v11 }
 0x640   : > { %v1158_v16 = vpop.permute.xlu1 %1157 }
 0x647   : > { %v2323_v12 = vpop.eup %2322 }
 0x648   : > { %v911_v13 = vmul.f32 %v2323_v12, %v2319_v1 }
 0x64a   : > { %2133 = vmatmul.mubr.msk.f32.vlgmr.msra.gmra.mrb[10].mxu1 %vm402_vm3, %v911_v13 }
 0x64b   : > { %2141 = vmatpush3.xpose.msk.msra.mxu1 %vm402_vm3, %v1160_v10  ;;  %2142 = vmatprep.mubr.msk.f32.mxu1 %vm2566_vm2, %v2565_v8 }
 0x64c   : > { %2150 = vmatprep.subr.mxu1 %v2565_v8 }
 0x64e   : > { %2143 = vmatmul.mubr.msk.f32.vlgmr.msra.gmra.mrb[12].mxu1 %vm402_vm3, %v1158_v16 }
 0x64f   : > { %2152 = vmatprep.mubr.msk.f32.mxu1 %vm2566_vm2, %v2565_v8 }
 0x6e0   : > { %v2935_v17 = vpop.f32.mrb[4].mxu0 }
 0x6e1   : > { %v2129_v18 = vpop.f32.mrb[5].mxu0 }
 0x6e2   : > { %v1767_v18 = vld [vmem:[#allocation10] sm:$0xff] }
 0x6e4   : > { %v1152_v19 = vpop.f32.mrb[6].mxu0 }
 0x6e5   : > { %v2139_v20 = vpop.f32.mrb[7].mxu0  ;;  %v1235_v21 = vsel %vm402_vm3, %v1152_v19, -inf }
 0x6e6   : > { %1236 = vmax.xlane.f32.xlu0 %v1235_v21 }
 0x71d   : > { %v2938_v22 = vpop.f32.mrb[10].mxu1 }
 0x71e   : > { %v2134_v23 = vpop.f32.mrb[11].mxu1 }
 0x71f   : > { %v1770_v23 = vld [vmem:[#allocation10 + $0x18] sm:$0xff] }
 0x721   : > { %v1231_v24 = vpop.f32.mrb[12].mxu1 }
 0x722   : > { %v2144_v25 = vpop.f32.mrb[13].mxu1  ;;  %v1238_v26 = vsel %vm402_vm3, %v1231_v24, -inf }
 0x723   : > { %1239 = vmax.xlane.f32.xlu1 %v1238_v26 }
 0x734   : > { %1257 = vrot.lane.b32.xlu1 %v2859_v14, %s2574_s15 }
 0x738   : > { %1425 = vrot.lane.b32.xlu1 %v2859_v14, %s2575_s11 }
 0x73c   : > { %1504 = vrot.lane.b32.xlu1 %v2862_v15, %s2575_s11 }
 0x740   : > { %1502 = vrot.lane.b32.xlu1 %v2862_v15, %s2576_s8 }
 0x773   : > { %v1237_v27 = vpop.xlane.xlu0 %1236 }
 0x774   : > { %v1241_v28 = vsub.f32 %v1152_v19, %v1237_v27 }
 0x776   : > { %v1243_v29 = vmul.f32 1.442695, %v1241_v28 }
 0x778   : > { %2324 = vpow2.f32 %v1243_v29 }
 0x782   : > { %v2325_v30 = vpop.eup %2324 }
 0x783   : > { %v1247_v31 = vsel %vm402_vm3, %v2325_v30, 0.0 }
 0x784   : > { %1248 = vadd.xlane.f32.xlu0 %v1247_v31  ;;  %v2030_v31 = vld [vmem:[#allocation12] ss:$0 sm:$0xff] }
 0x79a   : > { %1333 = vrot.lane.b32.xlu0 %v2862_v15, %s2574_s15  ;;  %s2486_s15 = sshll.u32 %s2581_s17, 4  ;;  %s2487_s15 = int_to_ptr.vmem [resolvable:$false] %s2486_s15 }
 0x79b   : > { %s2488_s11 = scalar_lea.vmem %s2487_s15, 512  ;;  %p2489_p12 = scmp.lt.s32.totalorder %s2988_s26, %s2487_s15 }
 0x79c   : > { %p2490_p1 = scmp.lt.s32.totalorder %s2488_s11, %s2482_s22 }
 0x79e   : > { %p2491_p2 = por %p2490_p1, %p2489_p12 }
 0x7a0   : > { %p2492_p13 = pnand %p2491_p2, %p2485_p7 }
 0x7b0   : > { %v1240_v32 = vpop.xlane.xlu1 %1239 }
 0x7b1   : > { %v1242_v33 = vsub.f32 %v1231_v24, %v1240_v32 }
 0x7b3   : > { %v1245_v34 = vmul.f32 1.442695, %v1242_v33 }
 0x7b4   : > { %v1258_v35 = vpop.permute.xlu1 %1257 }
 0x7b5   : > { %2326 = vpow2.f32 %v1245_v34  ;;  %2146 = vmatpush3.msra.mxu0 %v1258_v35 }
 0x7b6   : > { %2155 = vmatprep.subr.mxu0 %v2565_v8 }
 0x7b8   : > { %v1426_v42 = vpop.permute.xlu1 %1425 }
 0x7bc   : > { %v1505_v46 = vpop.permute.xlu1 %1504 }
 0x7bf   : > { %v2327_v36 = vpop.eup %2326 }
 0x7c0   : > { %v1250_v37 = vsel %vm402_vm3, %v2327_v36, 0.0  ;;  %v1503_v48 = vpop.permute.xlu1 %1502 }
 0x7c1   : > { %1251 = vadd.xlane.f32.xlu0 %v1250_v37 }
 0x7d7   : > { %1423 = vrot.lane.b32.xlu0 %v2859_v14, %s2576_s8 }
 0x811   : > { %v1249_v38 = vpop.xlane.xlu0 %1248 }
 0x812   : > { %2328 = vrcp.f32 %v1249_v38 }
 0x815   : > { %v1334_v39 = vpop.permute.xlu0 %1333 }
 0x816   : > { %2151 = vmatpush3.msra.mxu1 %v1334_v39 }
 0x817   : > { %2160 = vmatprep.subr.mxu1 %v2565_v8 }
 0x81c   : > { %v2329_v40 = vpop.eup %2328 }
 0x81d   : > { %v1255_v41 = vmul.f32 %v2329_v40, %v2325_v30 }
 0x81f   : > { %2148 = vmatmul.mubr.msk.f32.vlgmr.msra.gmra.mrb[8].mxu0 %vm402_vm3, %v1255_v41 }
 0x820   : > { %2156 = vmatpush3.xpose.msk.msra.mxu0 %vm402_vm3, %v1426_v42  ;;  %2157 = vmatprep.mubr.msk.f32.mxu0 %vm2566_vm2, %v2565_v8 }
 0x821   : > { %2165 = vmatprep.subr.mxu0 %v2565_v8 }
 0x84e   : > { %v1252_v43 = vpop.xlane.xlu0 %1251 }
 0x84f   : > { %2330 = vrcp.f32 %v1252_v43 }
 0x852   : > { %v1424_v44 = vpop.permute.xlu0 %1423 }
 0x853   : > { %2158 = vmatmul.mubr.msk.f32.vlgmr.msra.gmra.mrb[10].mxu0 %vm402_vm3, %v1424_v44 }
 0x854   : > { %2167 = vmatprep.mubr.msk.f32.mxu0 %vm2566_vm2, %v2565_v8 }
 0x859   : > { %v2331_v45 = vpop.eup %2330 }
 0x85a   : > { %v1256_v47 = vmul.f32 %v2331_v45, %v2327_v36 }
 0x85c   : > { %2153 = vmatmul.mubr.msk.f32.vlgmr.msra.gmra.mrb[14].mxu1 %vm402_vm3, %v1256_v47 }
 0x85d   : > { %2161 = vmatpush3.xpose.msk.msra.mxu1 %vm402_vm3, %v1505_v46  ;;  %2162 = vmatprep.mubr.msk.f32.mxu1 %vm2566_vm2, %v2565_v8 }
 0x85e   : > { %2170 = vmatprep.subr.mxu1 %v2565_v8 }
 0x860   : > { %2163 = vmatmul.mubr.msk.f32.vlgmr.msra.gmra.mrb[16].mxu1 %vm402_vm3, %v1503_v48 }
 0x861   : > { %2172 = vmatprep.mubr.msk.f32.mxu1 %vm2566_vm2, %v2565_v8 }
 0x8f2   : > { %v1329_v49 = vpop.f32.mrb[8].mxu0 }
 0x8f3   : > { %v2149_v50 = vpop.f32.mrb[9].mxu0 }
 0x926   : > { %v1497_v51 = vpop.f32.mrb[10].mxu0 }
 0x927   : > { %v2159_v52 = vpop.f32.mrb[11].mxu0  ;;  %v1580_v53 = vsel %vm402_vm3, %v1497_v51, -inf }
 0x928   : > { %1581 = vmax.xlane.f32.xlu0 %v1580_v53 }
 0x92f   : > { %v1405_v54 = vpop.f32.mrb[14].mxu1 }
 0x930   : > { %v2154_v55 = vpop.f32.mrb[15].mxu1 }
 0x933   : > { %v1576_v56 = vpop.f32.mrb[16].mxu1 }
 0x934   : > { %v2164_v57 = vpop.f32.mrb[17].mxu1  ;;  %v1583_v58 = vsel %vm402_vm3, %v1576_v56, -inf }
 0x935   : > { %1584 = vmax.xlane.f32.xlu1 %v1583_v58 }
 0x946   : > { %1602 = vrot.lane.b32.xlu1 %v2859_v14, %s2577_s29 }
 0x94a   : > { %1066 = vrot.lane.b32.xlu1 %v2935_v17, %s2578_s12 }
 0x94e   : > { %1068 = vrot.lane.b32.xlu1 %v2938_v22, %s2578_s12  ;;  %v1769_v22 = vld [vmem:[#allocation10 + $0x10] sm:$0xff] }
 0x94f   : > { %v2198_v24 = vpack.c.bf16 %v1770_v23, %v1769_v22 }
 0x952   : > { %1413 = vrot.lane.b32.xlu1 %v1405_v54, %s2579_s13 }
 0x9b5   : > { %v1582_v8 = vpop.xlane.xlu0 %1581 }
 0x9b6   : > { %v1586_v59 = vsub.f32 %v1497_v51, %v1582_v8 }
 0x9b8   : > { %v1588_v60 = vmul.f32 1.442695, %v1586_v59 }
 0x9ba   : > { %2332 = vpow2.f32 %v1588_v60 }
 0x9c2   : > { %v1585_v61 = vpop.xlane.xlu1 %1584 }
 0x9c3   : > { %v1587_v62 = vsub.f32 %v1576_v56, %v1585_v61 }
 0x9c4   : > { %v2333_v63 = vpop.eup %2332 }
 0x9c5   : > { %v1590_v0 = vmul.f32 1.442695, %v1587_v62  ;;  %v1592_v1 = vsel %vm402_vm3, %v2333_v63, 0.0 }
 0x9c6   : > { %v1603_v14 = vpop.permute.xlu1 %1602  ;;  %1593 = vadd.xlane.f32.xlu0 %v1592_v1 }
 0x9c7   : > { %2334 = vpow2.f32 %v1590_v0  ;;  %2166 = vmatpush3.msra.mxu0 %v1603_v14 }
 0x9ca   : > { %v1067_v2 = vpop.permute.xlu1 %1066 }
 0x9cb   : > { %1073 = vst.msk [vmem:[#allocation3] sm:$0xff] %vm1072_vm4, %v1067_v2 }
 0x9ce   : > { %v1069_v3 = vpop.permute.xlu1 %1068 }
 0x9cf   : > { %1074 = vst.msk [vmem:[#allocation3 + $0x8] sm:$0xff] %vm1072_vm4, %v1069_v3 }
 0x9d1   : > { %v2335_v4 = vpop.eup %2334 }
 0x9d2   : > { %v1414_v5 = vpop.permute.xlu1 %1413  ;;  %v1595_v6 = vsel %vm402_vm3, %v2335_v4, 0.0 }
 0x9d3   : > { %1419 = vst.msk [vmem:[#allocation3 + $0x8] sm:$0xff] %vm1417_vm5, %v1414_v5  ;;  %1596 = vadd.xlane.f32.xlu0 %v1595_v6 }
 0x9e9   : > { %1678 = vrot.lane.b32.xlu0 %v2862_v15, %s2577_s29  ;;  %v1768_v15 = vld [vmem:[#allocation10 + $0x8] sm:$0xff] }
 0x9ea   : > { %v2194_v20 = vpack.c.bf16 %v1768_v15, %v1767_v18 }
 0x9ec   : > { %2195 = vmatprep.subr.bf16.mxu0 %v2194_v20 }
 0x9ed   : > { %1411 = vrot.lane.b32.xlu0 %v1329_v49, %s2579_s13 }
 0xa53   : > { %v1594_v7 = vpop.xlane.xlu0 %1593 }
 0xa54   : > { %2336 = vrcp.f32 %v1594_v7 }
 0xa5e   : > { %v2337_v9 = vpop.eup %2336 }
 0xa5f   : > { %v1600_v10 = vmul.f32 %v2337_v9, %v2333_v63 }
 0xa60   : > { %v1597_v11 = vpop.xlane.xlu0 %1596 }
 0xa61   : > { %2338 = vrcp.f32 %v1597_v11  ;;  %2168 = vmatmul.mubr.msk.f32.vlgmr.msra.gmra.mrb[12].mxu0 %vm402_vm3, %v1600_v10 }
 0xa62   : > { %2197 = vmatpush3.bf16.msra.mxu0 %v2194_v20 }
 0xa63   : > { %2199 = vmatprep.subr.bf16.mxu0 %v2198_v24 }
 0xa64   : > { %v1679_v12 = vpop.permute.xlu0 %1678 }
 0xa65   : > { %2171 = vmatpush3.msra.mxu1 %v1679_v12 }
 0xa66   : > { %2201 = vmatpush3.bf16.msra.mxu0 %v2198_v24 }
 0xa68   : > { %v1412_v13 = vpop.permute.xlu0 %1411 }
 0xa69   : > { %1418 = vst.msk [vmem:[#allocation3] sm:$0xff] %vm1417_vm5, %v1412_v13 }
 0xa6b   : > { %v2339_v16 = vpop.eup %2338 }
 0xa6c   : > { %v1601_v17 = vmul.f32 %v2339_v16, %v2335_v4 }
 0xa6e   : > { %2173 = vmatmul.mubr.msk.f32.vlgmr.msra.gmra.mrb[18].mxu1 %vm402_vm3, %v1601_v17 }
 0xb34   : > { %v1674_v19 = vpop.f32.mrb[12].mxu0 }
 0xb35   : > { %1756 = vrot.lane.b32.xlu0 %v1674_v19, %s2580_s28  ;;  %v2169_v21 = vpop.f32.mrb[13].mxu0 }
 0xb41   : > { %v1750_v25 = vpop.f32.mrb[18].mxu1 }
 0xb42   : > { %1758 = vrot.lane.b32.xlu1 %v1750_v25, %s2580_s28  ;;  %v2174_v26 = vpop.f32.mrb[19].mxu1 }
 0xba7   : > { %v1757_v27 = vpop.permute.xlu0 %1756 }
 0xba8   : > { %1763 = vst.msk [vmem:[#allocation3] sm:$0xff] %vm1762_vm6, %v1757_v27 }
 0xbaf   : > { %v1765_v28 = vld [vmem:[#allocation3] sm:$0xff] }
 0xbb0   : > { %2183 = vmatprep.mubr.msk.f32.mxu0 %vm312_vm0, %v1765_v28 }
 0xbb4   : > { %v1759_v29 = vpop.permute.xlu1 %1758 }
 0xbb5   : > { %1764 = vst.msk [vmem:[#allocation3 + $0x8] sm:$0xff] %vm1762_vm6, %v1759_v29 }
 0xbbc   : > { %v1766_v30 = vld [vmem:[#allocation3 + $0x8] sm:$0xff] }
 0xbbd   : > { %2184 = vmatmul.mubr.msk.f32.vlgmr.msra.gmra.mrb[14].mxu0 %vm312_vm0, %v1766_v30 }
 0xc90   : > { %v2185_v32 = vpop.f32.mrb[14].mxu0 }
 0xc91   : > { %v1856_v33 = vadd.f32 %v2185_v32, %v2030_v31  ;;  %v1850_v34 = vpop.f32.mrb[15].mxu0 }
 0xc92   : > { %v1851_v35 = vadd.f32 %v2030_v31, %v1850_v34 }
 0xc93   : > { %1860 = vst.msk [vmem:[%s296_s24 + $0x8] sm:$0xff] %vm312_vm0, %v1856_v33 }
 0xc94   : > { %1859 = vst.msk [vmem:[%s296_s24] sm:$0xff] %vm312_vm0, %v1851_v35 }
 0xc95   : > { %2495 = shalt.err (!%p2492_p13)
}
 0xc96   : > { %s2496_s8 = scalar_lea.hbm %s2993_s6, 256  ;;  %s2500_s28 = scalar_lea.hbm %s3045_s5, 512 }
 0xc97   : > { %p2497_p9 = scmp.ne.s32.totalorder %s2993_s6, %s2496_s8  ;;  %p2501_p6 = scmp.lt.u32.totalorder %s2993_s6, %s3045_s5 }
 0xc98   : > { %p2502_p4 = scmp.lt.u32.totalorder %s2500_s28, %s2496_s8  ;;  %p2504_p3 = scmp.lt.u32.totalorder %s2496_s8, %s2993_s6 }
 0xc99   : > { %p2498_p0 = pnand %p2497_p9, %p2778_p10 }
 0xc9a   : > { %p2503_p8 = por %p2502_p4, %p2501_p6 }
 0xc9b   : > { %p2499_p11 = pneg %p2498_p0 }
 0xc9c   : > { %p2505_p5 = por %p2504_p3, %p2503_p8 }
 0xc9e   : > { %p2506_p7 = pnand %p2505_p5, %p2499_p11 }
 0xca0   : > { %2509 = shalt.err (!%p2506_p7)
}
 0xca1   : > { %s2582_s27 = smov 128  }
 0xca2   : > { %2220 = dma.vmem_to_hbm [thread:$0]  (%p2778_p10), %s2988_s26, 256, %s2993_s6, %s1862_s7, %s2582_s27, %s2582_s27, %s2578_s12  }
 0xca3 PF: > { %s1890_s16 = sand.u32 1, %s2544_s18   ;;  %p3063_p12 = scmp.ne.s32.totalorder %s3050_s25, 0 }
 0xca4   : > { %p3064_p1 = scmp.ge.s32.totalorder %s2556_s21, 2  ;;  %s1891_s22 = scalar_lea.sflag [#allocation6], %s1890_s16 }
 0xca6   : > { %p2240_p2 = pnand %p3064_p1, %p3063_p12 }
 0xca8   : > { %2539 = dma.done.wait (!%p2240_p2), %s1891_s22, 256  }
 0xca9   : > { %2541 = vsyncadd (!%p2240_p2), %s1891_s22, 4294967040  ;;  %p20_p13 = scmp.ge.s32.totalorder %s2768_s14, 4   ;;  %s3065_s18 = smov %s2548_s19 }
 0xcaa   : > { %s3066_s19 = smov %s2552_s20  ;;  %s3067_s20 = smov %s2784_s10 }
 0xcab   : > { %s3068_s21 = smov %s2768_s14  ;;  %22 = sbr.rel (!%p20_p13) target bundleno = 7 (0x7), region = 101 }
 0xcb2   :  { %1896 = vsyncpa [#allocation5], 1 }
 0xcb3   :  { %1898 = vsyncpa [#allocation5 + $0x1], 1 }
 0xcb4   :  { %1899 = vsyncpa [#allocation8], 1 }
 0xcb5   :  { %1900 = vsyncpa [#allocation11], 1 }
 0xcb6   :  { %1901 = vsyncpa [#allocation6], 1 }
 0xcb7   :  { %1903 = vsyncpa [#allocation6 + $0x1], 1 }

</bundles_post_ra>
